<compile_context>
chip_gen: v6e
topology: v6e:2x2x1
jax: 0.10.0
libtpu: 0.0.40
codegen_flags: <defaults>
</compile_context>

<pallas_src>
import functools
import math

import jax
import jax.numpy as jnp
from jax.experimental import pallas as pl
from jax.experimental.pallas import tpu as pltpu

IN_FEATURES = 784
OUT_FEATURES = 10
N_PAD = 128  # lane-dense output width (>= out_features, multiple of 128)


# --------------------------------------------------------------------------- #
# Kernels
# --------------------------------------------------------------------------- #
def _linear_kernel(x_ref, w_ref, b_ref, o_ref):
    # x:(TB,784) f32, w:(784,128) bf16 (pre-transposed/padded), b:(1,128) f32,
    # o:(TB,128) f32.  Cast x to bf16 on the VPU so the MXU runs a native bf16
    # matmul; accumulate in f32; lane-dense f32 store (no masked vst).
    x_bf16 = x_ref[...].astype(jnp.bfloat16)
    acc = jnp.dot(x_bf16, w_ref[...], preferred_element_type=jnp.float32)
    o_ref[...] = acc + b_ref[...]


def _linear_xent_kernel(x_ref, w_ref, b_ref, y_ref, loss_ref, *, out_features,
                        inv_batch):
    # Fused linear + log_softmax + NLL (mean).  exp -> EUP, row max/sum -> XLU,
    # both idle slots next to the matmul, so the epilogue is ~free in-kernel.
    x_bf16 = x_ref[...].astype(jnp.bfloat16)
    logits = jnp.dot(x_bf16, w_ref[...],
                     preferred_element_type=jnp.float32) + b_ref[...]
    b, n_pad = logits.shape

    lane = jax.lax.broadcasted_iota(jnp.int32, (b, n_pad), 1)
    valid = lane < out_features
    # Mask padded lanes so they contribute exp(~-inf)=0 to the denominator.
    masked = jnp.where(valid, logits, jnp.float32(-1e30))

    row_max = jnp.max(masked, axis=-1, keepdims=True)          # (B, 1)
    exp = jnp.exp(masked - row_max)                             # f32 epilogue
    lse = row_max + jnp.log(jnp.sum(exp, axis=-1, keepdims=True))

    onehot = lane == y_ref[...]                                 # (B, n_pad)
    picked = jnp.sum(jnp.where(onehot, logits, 0.0), axis=-1, keepdims=True)

    per_ex = lse - picked                                       # (B, 1)
    loss_ref[...] = jnp.sum(per_ex, axis=0, keepdims=True) * inv_batch


# --------------------------------------------------------------------------- #
# Parameter prep (one-time, NOT per forward call)
# --------------------------------------------------------------------------- #
def prepare_params(weight, bias, n_pad=N_PAD):
    """weight: (10, 784) f32 (PyTorch nn.Linear layout), bias: (10,) f32.

    Returns w_p: (784, n_pad) bf16 (transposed + zero-padded),
            b_p: (1,   n_pad) f32  (zero-padded).
    """
    out_features, in_features = weight.shape
    w_p = jnp.zeros((in_features, n_pad), jnp.bfloat16)
    w_p = w_p.at[:, :out_features].set(weight.T.astype(jnp.bfloat16))
    b_p = jnp.zeros((1, n_pad), jnp.float32)
    b_p = b_p.at[:, :out_features].set(bias.astype(jnp.float32))
    return w_p, b_p


# --------------------------------------------------------------------------- #
# Wrappers
# --------------------------------------------------------------------------- #
def _forward_cost(batch, n_pad):
    return pl.CostEstimate(
        flops=2 * batch * IN_FEATURES * n_pad,
        bytes_accessed=(batch * IN_FEATURES * 4 + IN_FEATURES * n_pad * 2
                        + n_pad * 4 + batch * n_pad * 4),
        transcendentals=0,
    )


def mnist_logistic_forward_padded(x, w_p, b_p, tb=None):
    """Returns lane-dense padded logits (B, N_PAD) f32; lanes [10:] are zeros."""
    batch, _ = x.shape
    n_pad = w_p.shape[1]
    out_shape = jax.ShapeDtypeStruct((batch, n_pad), jnp.float32)
    cost = _forward_cost(batch, n_pad)

    if tb is None:
        kind = jax.devices()[0].device_kind.lower()
        tb = 128 if "v5" in kind else 256  # v5e MXU M=128; v6e/v7x like 256

    if batch >= 2 * tb and batch % tb == 0:
        # Batch-tiled path: x/out tiled, weight & bias VMEM-resident across
        # grid steps; "parallel" axis lets v7x shard tiles over its 2 TCs.
        return pl.pallas_call(
            _linear_kernel,
            out_shape=out_shape,
            grid=(batch // tb,),
            in_specs=[
                pl.BlockSpec((tb, IN_FEATURES), lambda i: (i, 0)),
                pl.BlockSpec((IN_FEATURES, n_pad), lambda i: (0, 0)),
                pl.BlockSpec((1, n_pad), lambda i: (0, 0)),
            ],
            out_specs=pl.BlockSpec((tb, n_pad), lambda i: (i, 0)),
            compiler_params=pltpu.CompilerParams(
                dimension_semantics=("parallel",)),
            cost_estimate=cost,
        )(x, w_p, b_p)

    # Small-batch fast path: no grid, everything resident in VMEM (~0.5 MiB).
    return pl.pallas_call(
        _linear_kernel,
        out_shape=out_shape,
        in_specs=[pl.BlockSpec(memory_space=pltpu.MemorySpace.VMEM)] * 3,
        out_specs=pl.BlockSpec(memory_space=pltpu.MemorySpace.VMEM),
        cost_estimate=cost,
    )(x, w_p, b_p)


def mnist_logistic_forward(x, w_p, b_p, out_features=OUT_FEATURES):
    """Forward pass of Mnist_Logistic: (B, 784) f32 -> (B, 10) f32 logits.

    NOTE: the [:, :out_features] slice is one extra (tiny) XLA op kept only to
    match the module's (B, 10) output; latency-critical consumers should take
    the padded output or the fused mnist_logistic_loss directly.
    """
    return mnist_logistic_forward_padded(x, w_p, b_p)[:, :out_features]


def mnist_logistic_loss(x, y, w_p, b_p, out_features=OUT_FEATURES):
    """Fused forward + log_softmax + NLL (mean reduction). Returns scalar f32."""
    batch, _ = x.shape
    n_pad = w_p.shape[1]
    kernel = functools.partial(
        _linear_xent_kernel, out_features=out_features, inv_batch=1.0 / batch)
    loss = pl.pallas_call(
        kernel,
        out_shape=jax.ShapeDtypeStruct((1, 1), jnp.float32),
        in_specs=[pl.BlockSpec(memory_space=pltpu.MemorySpace.VMEM)] * 4,
        out_specs=pl.BlockSpec(memory_space=pltpu.MemorySpace.VMEM),
        cost_estimate=pl.CostEstimate(
            flops=2 * batch * IN_FEATURES * n_pad + 8 * batch * n_pad,
            bytes_accessed=(batch * IN_FEATURES * 4 + IN_FEATURES * n_pad * 2
                            + n_pad * 4 + batch * 4 + 4),
            transcendentals=batch * n_pad + batch,
        ),
    )(x, w_p, b_p, y.reshape(batch, 1).astype(jnp.int32))
    return loss[0, 0]


# --------------------------------------------------------------------------- #
# Self-test
# --------------------------------------------------------------------------- #
if __name__ == "__main__":
    key = jax.random.PRNGKey(0)
    k_x, k_w, k_b, k_y, k_x2 = jax.random.split(key, 5)

    bs = 64

    # Deterministic parameter init mimicking nn.Linear's default
    # (uniform in [-1/sqrt(fan_in), 1/sqrt(fan_in)]).
    bound = 1.0 / math.sqrt(IN_FEATURES)
    weight = jax.random.uniform(
        k_w, (OUT_FEATURES, IN_FEATURES), jnp.float32, -bound, bound)
    bias = jax.random.uniform(k_b, (OUT_FEATURES,), jnp.float32, -bound, bound)

    # Synthetic MNIST-like batch + targets.
    x = jax.random.uniform(k_x, (bs, IN_FEATURES), jnp.float32, 0.0, 1.0)
    y = jax.random.randint(k_y, (bs,), 0, OUT_FEATURES, jnp.int32)

    w_p, b_p = prepare_params(weight, bias)

    # --- forward (module semantics: logits) ---------------------------------
    fwd = jax.jit(mnist_logistic_forward, static_argnums=(3,))
    out = fwd(x, w_p, b_p, OUT_FEATURES)
    jax.block_until_ready(out)
    assert out.shape == (bs, OUT_FEATURES)

    # Reference 1: same bf16-cast operands, f32 accumulation -> tight check.
    x_bf = x.astype(jnp.bfloat16).astype(jnp.float32)
    w_bf = w_p[:, :OUT_FEATURES].astype(jnp.float32)
    ref_bf16 = x_bf @ w_bf + bias
    assert jnp.allclose(out, ref_bf16, atol=1e-3, rtol=1e-3)

    # Reference 2: pure f32 PyTorch-equivalent math -> loose check (bf16 inputs).
    ref_f32 = x @ weight.T + bias
    assert jnp.allclose(out, ref_f32, atol=2e-2, rtol=2e-2)

    # --- fused linear + log_softmax + NLL ------------------------------------
    loss_fn = jax.jit(mnist_logistic_loss, static_argnums=(4,))
    loss = loss_fn(x, y, w_p, b_p, OUT_FEATURES)
    jax.block_until_ready(loss)
    lse = jax.scipy.special.logsumexp(ref_bf16, axis=-1)
    picked = jnp.take_along_axis(ref_bf16, y[:, None], axis=-1)[:, 0]
    ref_loss = jnp.mean(lse - picked)
    assert jnp.allclose(loss, ref_loss, atol=5e-3, rtol=5e-3)

    # --- batch-tiled grid path (weights VMEM-resident across tiles) ----------
    bs_big = 512
    x_big = jax.random.uniform(k_x2, (bs_big, IN_FEATURES), jnp.float32, 0.0, 1.0)
    fwd_pad = jax.jit(mnist_logistic_forward_padded)
    out_big = fwd_pad(x_big, w_p, b_p)
    jax.block_until_ready(out_big)
    assert out_big.shape == (bs_big, N_PAD)
    x_big_bf = x_big.astype(jnp.bfloat16).astype(jnp.float32)
    ref_big = x_big_bf @ w_bf + bias
    assert jnp.allclose(out_big[:, :OUT_FEATURES], ref_big, atol=1e-3, rtol=1e-3)
    assert jnp.allclose(out_big[:, OUT_FEATURES:], 0.0)  # padded lanes stay 0

    print("KERNEL_OK")
</pallas_src>

<mosaic_0001>
module attributes {stable_mosaic.version = 11 : i64} {
  func.func @_linear_kernel(%arg0: memref<64x784xf32, #tpu.memory_space<vmem>>, %arg1: memref<784x128xbf16, #tpu.memory_space<vmem>>, %arg2: memref<1x128xf32, #tpu.memory_space<vmem>>, %arg3: memref<64x128xf32, #tpu.memory_space<vmem>>) attributes {dimension_semantics = [], scalar_prefetch = 0 : i64, scratch_operands = 0 : i64, tpu.core_type = #tpu.core_type<tc>} {
    %c0 = arith.constant 0 : index
    %c0_0 = arith.constant 0 : index
    %0 = vector.load %arg0[%c0, %c0_0] : memref<64x784xf32, #tpu.memory_space<vmem>>, vector<64x784xf32>
    %1 = arith.truncf %0 : vector<64x784xf32> to vector<64x784xbf16>
    %c0_1 = arith.constant 0 : index
    %c0_2 = arith.constant 0 : index
    %2 = vector.load %arg1[%c0_1, %c0_2] : memref<784x128xbf16, #tpu.memory_space<vmem>>, vector<784x128xbf16>
    %cst = arith.constant dense<0.000000e+00> : vector<64x128xf32>
    %3 = tpu.matmul %1, %2, %cst {dimension_numbers = #tpu.dot_dimension_numbers<[1], [0], [0], [1], [0, 0, 1, 1], [], []>} : vector<64x784xbf16>, vector<784x128xbf16>, vector<64x128xf32> -> vector<64x128xf32>
    %c0_3 = arith.constant 0 : index
    %c0_4 = arith.constant 0 : index
    %4 = vector.load %arg2[%c0_3, %c0_4] : memref<1x128xf32, #tpu.memory_space<vmem>>, vector<1x128xf32>
    %5 = vector.broadcast %4 : vector<1x128xf32> to vector<64x128xf32>
    %6 = arith.addf %3, %5 : vector<64x128xf32>
    %c0_5 = arith.constant 0 : index
    %c0_6 = arith.constant 0 : index
    %7 = vector.load %arg3[%c0_5, %c0_6] : memref<64x128xf32, #tpu.memory_space<vmem>>, vector<64x128xf32>
    tpu.vector_store %arg3[%c0_5, %c0_6], %6 {strides = array<i32>} : memref<64x128xf32, #tpu.memory_space<vmem>>, vector<64x128xf32>,
    return
  }
}

</mosaic_0001>

<bundles_post_ra>
// kernel: mnist_logistic_forward.1
= control target key start
LH: loop header
LB: loop body
LE: loop exit
PB: predicated region body
PF: predicated region fallthrough
CT: control target
= control target key end

     0   :  { %8 = vsyncpa [#allocation3], 0  ;;  %s1196_s0 = inlined_call_operand.hbm [shape: f32[64,784], index: 0, kind: input, shape index: {}]   ;;  %s1197_s1 = inlined_call_operand.hbm [shape: bf16[784,128], index: 1, kind: input, shape index: {}]   ;;  %s1198_s2 = inlined_call_operand.vmem [shape: f32[1,128], index: 2, kind: input, shape index: {}]   ;;  %s1199_s3 = inlined_call_operand.vmem [shape: f32[64,128], index: 3, kind: output, shape index: {}]  }
   0x1   :  { %9 = vsyncpa [#allocation5], 0  ;;  %s1117_s12 = smov [#allocation2]  }
   0x2   :  { %s15_s13 = sshll.u32 %s1117_s12, 4  ;;  %s16_s13 = int_to_ptr.vmem [resolvable:$true] %s15_s13 }
   0x3   :  { %s1081_s14 = scalar_lea.vmem %s16_s13, 7168  ;;  %p1086_p1 = scmp.lt.s32.totalorder %s16_s13, %s16_s13 }
   0x4   :  { %p1082_p0 = scmp.ne.s32.totalorder %s16_s13, %s1081_s14  ;;  %p1087_p2 = scmp.lt.s32.totalorder %s1081_s14, %s1081_s14 }
   0x6   :  { %p1088_p3 = por %p1087_p2, %p1086_p1 }
   0x8   :  { %p1089_p4 = pnand %p1088_p3, %p1082_p0 }
   0xa   :  { %1092 = shalt.err (!%p1089_p4)
}
   0xb   :  { %s1118_s15 = smov 896   ;;  %s1119_s16 = smov 56  }
   0xc   :  { %21 = dma.hbm_to_vmem [thread:$0]  %s1196_s0, 7168, %s16_s13, [#allocation3], %s1118_s15, %s1118_s15, %s1119_s16  }
   0xd   :  { %s1120_s19 = smov [#allocation4]  }
   0xe   :  { %s27_s20 = sshll.u32 %s1120_s19, 4  ;;  %s28_s20 = int_to_ptr.vmem [resolvable:$true] %s27_s20 }
   0xf   :  { %s1101_s21 = scalar_lea.vmem %s28_s20, 6272  ;;  %p1106_p6 = scmp.lt.s32.totalorder %s28_s20, %s28_s20 }
  0x10   :  { %p1102_p5 = scmp.ne.s32.totalorder %s28_s20, %s1101_s21  ;;  %p1107_p7 = scmp.lt.s32.totalorder %s1101_s21, %s1101_s21 }
  0x12   :  { %p1108_p8 = por %p1107_p7, %p1106_p6 }
  0x14   :  { %p1109_p9 = pnand %p1108_p8, %p1102_p5 }
  0x16   :  { %1112 = shalt.err (!%p1109_p9)
}
  0x17   :  { %s1121_s22 = smov 64   ;;  %s1122_s23 = smov 4  }
  0x18   :  { %33 = dma.hbm_to_vmem [thread:$0]  %s1197_s1, 6272, %s28_s20, [#allocation5], %s1121_s22, %s1121_s22, %s1122_s23  }
  0x19   :  { %1113 = dma.done.wait [#allocation3], 7168  }
  0x1a   :  { %1114 = vsyncadd [#allocation3], 4294960128 }
  0x1b   :  { %1115 = dma.done.wait [#allocation5], 6272  }
  0x1c   :  { %1116 = vsyncadd [#allocation5], 4294961024  ;;  %v1024_v0 = vld [vmem:[#allocation4 + $0x78] sm:$0xff]   ;;  %v1028_v4 = vld [vmem:[#allocation4 + $0x70] sm:$0xff]   ;;  %vm526_vm0 = vcmask 130048  }
  0x1d   :  { %v1025_v1 = vld [vmem:[#allocation4 + $0xf8] sm:$0xff]   ;;  %867 = vmatprep.subr.bf16.mxu0 %v1024_v0  ;;  %v1029_v5 = vld [vmem:[#allocation4 + $0xf0] sm:$0xff]   ;;  %v1032_v8 = vld [vmem:[#allocation4 + $0x68] sm:$0xff]  }
  0x1e   :  { %v1026_v2 = vld [vmem:[#allocation4 + $0x38] sm:$0xff]   ;;  %907 = vmatprep.subr.bf16.mxu1 %v1025_v1  ;;  %v1030_v6 = vld [vmem:[#allocation4 + $0x30] sm:$0xff]   ;;  %v1033_v9 = vld [vmem:[#allocation4 + $0xe8] sm:$0xff]  }
  0x1f   :  { %v1027_v3 = vld [vmem:[#allocation4 + $0xb8] sm:$0xff]   ;;  %868 = vmatpush3.bf16.msra.mxu0 %v1026_v2  ;;  %v1031_v7 = vld [vmem:[#allocation4 + $0xb0] sm:$0xff]   ;;  %v1034_v10 = vld [vmem:[#allocation4 + $0x28] sm:$0xff]  }
  0x20   :  { %908 = vmatpush3.bf16.msra.mxu1 %v1027_v3  ;;  %869 = vmatprep.subr.bf16.mxu0 %v1028_v4  ;;  %v1035_v11 = vld [vmem:[#allocation4 + $0xa8] sm:$0xff]   ;;  %v1036_v12 = vld [vmem:[#allocation4 + $0x60] sm:$0xff]   ;;  %v1040_v16 = vld [vmem:[#allocation4 + $0x58] sm:$0xff]  }
  0x21   :  { %909 = vmatprep.subr.bf16.mxu1 %v1029_v5  ;;  %v1037_v13 = vld [vmem:[#allocation4 + $0xe0] sm:$0xff]   ;;  %v1041_v17 = vld [vmem:[#allocation4 + $0xd8] sm:$0xff]   ;;  %v1044_v20 = vld [vmem:[#allocation4 + $0x50] sm:$0xff]  }
  0x22   :  { %v1038_v14 = vld [vmem:[#allocation4 + $0x20] sm:$0xff]   ;;  %v1042_v18 = vld [vmem:[#allocation4 + $0x18] sm:$0xff]   ;;  %v1045_v21 = vld [vmem:[#allocation4 + $0xd0] sm:$0xff]  }
  0x23   :  { %870 = vmatpush3.bf16.msra.mxu0 %v1030_v6  ;;  %v1039_v15 = vld [vmem:[#allocation4 + $0xa0] sm:$0xff]   ;;  %v1043_v19 = vld [vmem:[#allocation4 + $0x98] sm:$0xff]   ;;  %v1046_v22 = vld [vmem:[#allocation4 + $0x10] sm:$0xff]  }
  0x24   :  { %910 = vmatpush3.bf16.msra.mxu1 %v1031_v7  ;;  %871 = vmatprep.subr.bf16.mxu0 %v1032_v8  ;;  %v1047_v23 = vld [vmem:[#allocation4 + $0x90] sm:$0xff]   ;;  %v1048_v24 = vld [vmem:[#allocation4 + $0x48] sm:$0xff]   ;;  %v1052_v28 = vld [vmem:[#allocation4 + $0x40] sm:$0xff]  }
  0x25   :  { %911 = vmatprep.subr.bf16.mxu1 %v1033_v9  ;;  %v1049_v25 = vld [vmem:[#allocation4 + $0xc8] sm:$0xff]   ;;  %v1053_v29 = vld [vmem:[#allocation4 + $0xc0] sm:$0xff]   ;;  %v46_v34 = vld [vmem:[#allocation2 + $0x18] sm:$0xff] }
  0x26   :  { %v1050_v26 = vld [vmem:[#allocation4 + $0x8] sm:$0xff]   ;;  %v1054_v30 = vld [vmem:[#allocation4] sm:$0xff]   ;;  %v53_v36 = vld [vmem:[#allocation2 + $0x50] sm:$0xff] }
  0x27   :  { %872 = vmatpush3.bf16.msra.mxu0 %v1034_v10  ;;  %v1051_v27 = vld [vmem:[#allocation4 + $0x88] sm:$0xff]   ;;  %v1055_v31 = vld [vmem:[#allocation4 + $0x80] sm:$0xff]   ;;  %v50_v38 = vld [vmem:[#allocation2 + $0x38] sm:$0xff]  ;;  %v102_v39 = vpack.c.bf16 %v53_v36, %v46_v34 }
  0x28   :  { %912 = vmatpush3.bf16.msra.mxu1 %v1035_v11  ;;  %873 = vmatprep.subr.bf16.mxu0 %v1036_v12  ;;  %v44_v32 = vld [vmem:[#allocation2 + $0x8] sm:$0xff]  ;;  %v51_v33 = vld [vmem:[#allocation2 + $0x40] sm:$0xff]  ;;  %v45_v41 = vld [vmem:[#allocation2 + $0x10] sm:$0xff] }
  0x29   :  { %913 = vmatprep.subr.bf16.mxu1 %v1037_v13  ;;  %v100_v35 = vpack.c.bf16 %v51_v33, %v44_v32  ;;  %v43_v37 = vld [vmem:[#allocation2] sm:$0xff]  ;;  %v52_v42 = vld [vmem:[#allocation2 + $0x48] sm:$0xff]  ;;  %v1056_v44 = vld [vmem:[#allocation4 + $0x178] sm:$0xff]   ;;  %636 = vmatprep.mubr.bf16.mxu1 %v102_v39 }
  0x2a   :  { %v99_v40 = vpack.c.bf16 %v50_v38, %v43_v37  ;;  %v101_v43 = vpack.c.bf16 %v52_v42, %v45_v41  ;;  %v1057_v45 = vld [vmem:[#allocation4 + $0x138] sm:$0xff]   ;;  %v1058_v46 = vld [vmem:[#allocation4 + $0x170] sm:$0xff]   ;;  %v60_v50 = vld [vmem:[#allocation2 + $0x88] sm:$0xff] }
  0x2b   :  { %874 = vmatpush3.bf16.msra.mxu0 %v1038_v14  ;;  %571 = vmatprep.mubr.bf16.mxu0 %v100_v35  ;;  %v1059_v47 = vld [vmem:[#allocation4 + $0x130] sm:$0xff]   ;;  %v58_v48 = vld [vmem:[#allocation2 + $0x78] sm:$0xff]  ;;  %v67_v51 = vld [vmem:[#allocation2 + $0xc0] sm:$0xff] }
  0x2c   :  { %914 = vmatpush3.bf16.msra.mxu1 %v1039_v15  ;;  %875 = vmatprep.subr.bf16.mxu0 %v1040_v16  ;;  %v65_v49 = vld [vmem:[#allocation2 + $0xb0] sm:$0xff]  ;;  %v109_v53 = vpack.c.bf16 %v67_v51, %v60_v50  ;;  %v64_v55 = vld [vmem:[#allocation2 + $0xa8] sm:$0xff]  ;;  %v59_v56 = vld [vmem:[#allocation2 + $0x80] sm:$0xff] }
  0x2d   :  { %915 = vmatprep.subr.bf16.mxu1 %v1041_v17  ;;  %v107_v52 = vpack.c.bf16 %v65_v49, %v58_v48  ;;  %v57_v54 = vld [vmem:[#allocation2 + $0x70] sm:$0xff]  ;;  %v66_v58 = vld [vmem:[#allocation2 + $0xb8] sm:$0xff]  ;;  %v1060_v60 = vld [vmem:[#allocation4 + $0x168] sm:$0xff]  }
  0x2e   :  { %v106_v57 = vpack.c.bf16 %v64_v55, %v57_v54  ;;  %v108_v59 = vpack.c.bf16 %v66_v58, %v59_v56  ;;  %v1061_v61 = vld [vmem:[#allocation4 + $0x128] sm:$0xff]   ;;  %v1062_v62 = vld [vmem:[#allocation4 + $0x160] sm:$0xff]   ;;  %v74_v3 = vld [vmem:[#allocation2 + $0xf8] sm:$0xff] }
  0x2f   :  { %876 = vmatpush3.bf16.msra.mxu0 %v1042_v18  ;;  %v1063_v63 = vld [vmem:[#allocation4 + $0x120] sm:$0xff]   ;;  %v72_v0 = vld [vmem:[#allocation2 + $0xe8] sm:$0xff]  ;;  %v81_v4 = vld [vmem:[#allocation2 + $0x130] sm:$0xff] }
  0x30   :  { %916 = vmatpush3.bf16.msra.mxu1 %v1043_v19  ;;  %877 = vmatprep.subr.bf16.mxu0 %v1044_v20  ;;  %v79_v1 = vld [vmem:[#allocation2 + $0x120] sm:$0xff]  ;;  %v116_v6 = vpack.c.bf16 %v81_v4, %v74_v3  ;;  %v78_v7 = vld [vmem:[#allocation2 + $0x118] sm:$0xff]  ;;  %v73_v8 = vld [vmem:[#allocation2 + $0xf0] sm:$0xff] }
  0x31   :  { %917 = vmatprep.subr.bf16.mxu1 %v1045_v21  ;;  %v114_v2 = vpack.c.bf16 %v79_v1, %v72_v0  ;;  %v71_v5 = vld [vmem:[#allocation2 + $0xe0] sm:$0xff]  ;;  %v80_v9 = vld [vmem:[#allocation2 + $0x128] sm:$0xff]  ;;  %v1064_v11 = vld [vmem:[#allocation4 + $0x158] sm:$0xff]  }
  0x32   :  { %v113_v10 = vpack.c.bf16 %v78_v7, %v71_v5  ;;  %v115_v12 = vpack.c.bf16 %v80_v9, %v73_v8  ;;  %v1065_v13 = vld [vmem:[#allocation4 + $0x118] sm:$0xff]   ;;  %v1066_v14 = vld [vmem:[#allocation4 + $0x150] sm:$0xff]   ;;  %v88_v18 = vld [vmem:[#allocation2 + $0x168] sm:$0xff] }
  0x33   :  { %878 = vmatpush3.bf16.msra.mxu0 %v1046_v22  ;;  %v1067_v15 = vld [vmem:[#allocation4 + $0x110] sm:$0xff]   ;;  %v86_v16 = vld [vmem:[#allocation2 + $0x158] sm:$0xff]  ;;  %v95_v20 = vld [vmem:[#allocation2 + $0x1a0] sm:$0xff] }
  0x34   :  { %918 = vmatpush3.bf16.msra.mxu1 %v1047_v23  ;;  %879 = vmatprep.subr.bf16.mxu0 %v1048_v24  ;;  %v93_v17 = vld [vmem:[#allocation2 + $0x190] sm:$0xff]  ;;  %v92_v22 = vld [vmem:[#allocation2 + $0x188] sm:$0xff]  ;;  %v123_v23 = vpack.c.bf16 %v95_v20, %v88_v18  ;;  %v87_v24 = vld [vmem:[#allocation2 + $0x160] sm:$0xff] }
  0x35   :  { %919 = vmatprep.subr.bf16.mxu1 %v1049_v25  ;;  %v121_v19 = vpack.c.bf16 %v93_v17, %v86_v16  ;;  %v85_v21 = vld [vmem:[#allocation2 + $0x150] sm:$0xff]  ;;  %v94_v25 = vld [vmem:[#allocation2 + $0x198] sm:$0xff]  ;;  %v55_v32 = vld [vmem:[#allocation2 + $0x60] sm:$0xff] }
  0x36   :  { %v90_v33 = vld [vmem:[#allocation2 + $0x178] sm:$0xff]  ;;  %v97_v34 = vld [vmem:[#allocation2 + $0x1b0] sm:$0xff]  ;;  %v1071_v37 = vld [vmem:[#allocation4 + $0x100] sm:$0xff]  }
  0x37   :  { %880 = vmatpush3.bf16.msra.mxu0 %v1050_v26  ;;  %v1068_v26 = vld [vmem:[#allocation4 + $0x148] sm:$0xff]   ;;  %v125_v36 = vpack.c.bf16 %v97_v34, %v90_v33  ;;  %v47_v38 = vld [vmem:[#allocation2 + $0x20] sm:$0xff]  ;;  %v54_v39 = vld [vmem:[#allocation2 + $0x58] sm:$0xff] }
  0x38   :  { %920 = vmatpush3.bf16.msra.mxu1 %v1051_v27  ;;  %881 = vmatprep.subr.bf16.mxu0 %v1052_v28  ;;  %v120_v27 = vpack.c.bf16 %v92_v22, %v85_v21  ;;  %v122_v28 = vpack.c.bf16 %v94_v25, %v87_v24  ;;  %v96_v41 = vld [vmem:[#allocation2 + $0x1a8] sm:$0xff]  ;;  %v62_v42 = vld [vmem:[#allocation2 + $0x98] sm:$0xff]  ;;  %v61_v51 = vld [vmem:[#allocation2 + $0x90] sm:$0xff] }
  0x39   :  { %921 = vmatprep.subr.bf16.mxu1 %v1053_v29  ;;  %v1069_v29 = vld [vmem:[#allocation4 + $0x108] sm:$0xff]   ;;  %v70_v54 = vld [vmem:[#allocation2 + $0xd8] sm:$0xff]  ;;  %v83_v56 = vld [vmem:[#allocation2 + $0x140] sm:$0xff] }
  0x3a   :  { %v76_v55 = vld [vmem:[#allocation2 + $0x108] sm:$0xff]  ;;  %v82_v0 = vld [vmem:[#allocation2 + $0x138] sm:$0xff]  ;;  %v91_v1 = vld [vmem:[#allocation2 + $0x180] sm:$0xff] }
  0x3b   :  { %882 = vmatpush3.bf16.msra.mxu0 %v1054_v30  ;;  %v1070_v30 = vld [vmem:[#allocation4 + $0x140] sm:$0xff]   ;;  %v84_v58 = vld [vmem:[#allocation2 + $0x148] sm:$0xff] }
  0x3c   :  { %922 = vmatpush3.bf16.msra.mxu1 %v1055_v31  ;;  %947 = vmatprep.subr.bf16.mxu0 %v1056_v44  ;;  %v48_v31 = vld [vmem:[#allocation2 + $0x28] sm:$0xff] }
  0x3d   :  { %1002 = vmatprep.subr.bf16.mxu1 %v1056_v44  ;;  %v104_v35 = vpack.c.bf16 %v55_v32, %v48_v31  ;;  %v1072_v44 = vld [vmem:[#allocation4 + $0x180] sm:$0xff]  }
  0x3e   :  { %572 = vmatmul.mubr.bf16.vlgmr.msra.gmra.mxu0 %v99_v40  ;;  %v89_v40 = vld [vmem:[#allocation2 + $0x170] sm:$0xff] }
  0x3f   :  { %637 = vmatmul.mubr.bf16.vlgmr.msra.gmra.mxu1 %v101_v43  ;;  %948 = vmatpush3.bf16.msra.mxu0 %v1057_v45  ;;  %v69_v43 = vld [vmem:[#allocation2 + $0xd0] sm:$0xff]  ;;  %v124_v48 = vpack.c.bf16 %v96_v41, %v89_v40 }
  0x40   :  { %1010 = vmatpush3.bf16.msra.mxu1 %v1057_v45  ;;  %949 = vmatprep.subr.bf16.mxu0 %v1058_v46  ;;  %v49_v45 = vld [vmem:[#allocation2 + $0x30] sm:$0xff]  ;;  %v111_v49 = vpack.c.bf16 %v69_v43, %v62_v42 }
  0x41   :  { %1003 = vmatprep.subr.bf16.mxu1 %v1058_v46  ;;  %579 = vmatprep.mubr.bf16.mxu0 %v107_v52  ;;  %v56_v46 = vld [vmem:[#allocation2 + $0x68] sm:$0xff] }
  0x42   :  { %644 = vmatprep.mubr.bf16.mxu1 %v109_v53  ;;  %v105_v50 = vpack.c.bf16 %v56_v46, %v49_v45  ;;  %v68_v52 = vld [vmem:[#allocation2 + $0xc8] sm:$0xff]  ;;  %v63_v53 = vld [vmem:[#allocation2 + $0xa0] sm:$0xff] }
  0x43   :  { %950 = vmatpush3.bf16.msra.mxu0 %v1059_v47 }
  0x44   :  { %1011 = vmatpush3.bf16.msra.mxu1 %v1059_v47  ;;  %951 = vmatprep.subr.bf16.mxu0 %v1060_v60  ;;  %v103_v47 = vpack.c.bf16 %v54_v39, %v47_v38  ;;  %v1160_v39 = vld [vmem:[%s1198_s2] ss:$0 sm:$0xff] }
  0x45   :  { %1004 = vmatprep.subr.bf16.mxu1 %v1060_v60  ;;  %v112_v60 = vpack.c.bf16 %v70_v54, %v63_v53 }
  0x46   :  { %580 = vmatmul.mubr.bf16.gmra.mxu0 %v106_v57  ;;  %v77_v57 = vld [vmem:[#allocation2 + $0x110] sm:$0xff] }
  0x47   :  { %645 = vmatmul.mubr.bf16.gmra.mxu1 %v108_v59  ;;  %952 = vmatpush3.bf16.msra.mxu0 %v1061_v61  ;;  %v110_v59 = vpack.c.bf16 %v68_v52, %v61_v51 }
  0x48   :  { %1012 = vmatpush3.bf16.msra.mxu1 %v1061_v61  ;;  %953 = vmatprep.subr.bf16.mxu0 %v1062_v62  ;;  %v118_v61 = vpack.c.bf16 %v83_v56, %v76_v55 }
  0x49   :  { %1005 = vmatprep.subr.bf16.mxu1 %v1062_v62  ;;  %587 = vmatprep.mubr.bf16.mxu0 %v114_v2  ;;  %v119_v62 = vpack.c.bf16 %v84_v58, %v77_v57  ;;  %v98_v2 = vld [vmem:[#allocation2 + $0x1b8] sm:$0xff] }
  0x4a   :  { %652 = vmatprep.mubr.bf16.mxu1 %v116_v6  ;;  %v126_v4 = vpack.c.bf16 %v98_v2, %v91_v1 }
  0x4b   :  { %954 = vmatpush3.bf16.msra.mxu0 %v1063_v63 }
  0x4c   :  { %1013 = vmatpush3.bf16.msra.mxu1 %v1063_v63  ;;  %955 = vmatprep.subr.bf16.mxu0 %v1064_v11  ;;  %v75_v63 = vld [vmem:[#allocation2 + $0x100] sm:$0xff] }
  0x4d   :  { %1006 = vmatprep.subr.bf16.mxu1 %v1064_v11  ;;  %v117_v3 = vpack.c.bf16 %v82_v0, %v75_v63 }
  0x4e   :  { %588 = vmatmul.mubr.bf16.gmra.mxu0 %v113_v10 }
  0x4f   :  { %653 = vmatmul.mubr.bf16.gmra.mxu1 %v115_v12  ;;  %956 = vmatpush3.bf16.msra.mxu0 %v1065_v13 }
  0x50   :  { %1014 = vmatpush3.bf16.msra.mxu1 %v1065_v13  ;;  %957 = vmatprep.subr.bf16.mxu0 %v1066_v14 }
  0x51   :  { %1007 = vmatprep.subr.bf16.mxu1 %v1066_v14  ;;  %595 = vmatprep.mubr.bf16.mxu0 %v121_v19 }
  0x52   :  { %660 = vmatprep.mubr.bf16.mxu1 %v123_v23 }
  0x53   :  { %958 = vmatpush3.bf16.msra.mxu0 %v1067_v15 }
  0x54   :  { %1015 = vmatpush3.bf16.msra.mxu1 %v1067_v15  ;;  %959 = vmatprep.subr.bf16.mxu0 %v1068_v26 }
  0x55   :  { %1008 = vmatprep.subr.bf16.mxu1 %v1068_v26 }
  0x56   :  { %596 = vmatmul.mubr.bf16.gmra.mxu0 %v120_v27 }
  0x57   :  { %661 = vmatmul.mubr.bf16.gmra.mxu1 %v122_v28  ;;  %960 = vmatpush3.bf16.msra.mxu0 %v1069_v29 }
  0x58   :  { %701 = vmatprep.mubr.bf16.mxu0 %v104_v35  ;;  %1016 = vmatpush3.bf16.msra.mxu1 %v1069_v29 }
  0x59   :  { %961 = vmatprep.subr.bf16.mxu0 %v1070_v30  ;;  %1009 = vmatprep.subr.bf16.mxu1 %v1070_v30 }
  0x5a   :  { %725 = vmatprep.mubr.bf16.mxu1 %v125_v36 }
  0x5b   :  { %962 = vmatpush3.bf16.msra.mxu0 %v1071_v37 }
  0x5c   :  { %1017 = vmatpush3.bf16.msra.mxu1 %v1071_v37 }
  0x5d   :  { %992 = vmatprep.subr.bf16.mxu1 %v1072_v44 }
  0x5e   :  { %702 = vmatmul.mubr.bf16.vlgmr.msra.gmra.mxu0 %v103_v47 }
  0x5f   :  { %726 = vmatmul.mubr.bf16.vlgmr.msra.gmra.mxu1 %v124_v48  ;;  %709 = vmatprep.mubr.bf16.mxu0 %v111_v49 }
  0x60   :  { %993 = vmatpush3.bf16.msra.mxu1 %v1072_v44  ;;  %994 = vmatprep.mubr.msk.bf16.mxu1 %vm526_vm0, %v105_v50 }
  0x66   :  { %710 = vmatmul.mubr.bf16.gmra.mxu0 %v110_v59 }
  0x67   :  { %995 = vmatmul.mubr.msk.bf16.vlgmr.msra.gmra.mxu1 %vm526_vm0, %v112_v60  ;;  %717 = vmatprep.mubr.bf16.mxu0 %v118_v61 }
  0x68   :  { %998 = vmatprep.mubr.msk.bf16.mxu1 %vm526_vm0, %v119_v62 }
  0x6e   :  { %718 = vmatmul.mubr.bf16.gmra.mxu0 %v117_v3 }
  0x6f   :  { %999 = vmatmul.mubr.msk.bf16.gmra.mxu1 %vm526_vm0, %v126_v4 }
  0xfe   :  { %v883_v5 = vpop.f32.mrf.mxu0 }
  0xff   :  { %v923_v6 = vpop.f32.mrf.mxu1 }
 0x100   :  { %v884_v7 = vpop.f32.mrf.mxu0 }
 0x101   :  { %v924_v8 = vpop.f32.mrf.mxu1  ;;  %v885_v37 = vadd.f32 %v884_v7, %v883_v5 }
 0x102   :  { %v886_v9 = vpop.f32.mrf.mxu0  ;;  %v925_v45 = vadd.f32 %v924_v8, %v923_v6 }
 0x103   :  { %v926_v10 = vpop.f32.mrf.mxu1  ;;  %v574_v44 = vadd.f32 %v885_v37, %v1160_v39 }
 0x104   :  { %v887_v11 = vpop.f32.mrf.mxu0 }
 0x105   :  { %v927_v12 = vpop.f32.mrf.mxu1  ;;  %v888_v46 = vadd.f32 %v887_v11, %v886_v9  ;;  %v639_v56 = vadd.f32 %v925_v45, %v574_v44 }
 0x106   :  { %v889_v13 = vpop.f32.mrf.mxu0  ;;  %v928_v59 = vadd.f32 %v927_v12, %v926_v10 }
 0x107   :  { %v929_v14 = vpop.f32.mrf.mxu1  ;;  %v577_v57 = vadd.f32 %v888_v46, %v1160_v39 }
 0x108   :  { %v890_v15 = vpop.f32.mrf.mxu0 }
 0x109   :  { %v930_v16 = vpop.f32.mrf.mxu1  ;;  %v891_v42 = vadd.f32 %v890_v15, %v889_v13  ;;  %v642_v9 = vadd.f32 %v928_v59, %v577_v57 }
 0x10a   :  { %v892_v17 = vpop.f32.mrf.mxu0  ;;  %v931_v54 = vadd.f32 %v930_v16, %v929_v14 }
 0x10b   :  { %v932_v18 = vpop.f32.mrf.mxu1  ;;  %v582_v53 = vadd.f32 %v891_v42, %v1160_v39 }
 0x10c   :  { %v893_v19 = vpop.f32.mrf.mxu0 }
 0x10d   :  { %v933_v20 = vpop.f32.mrf.mxu1  ;;  %v894_v48 = vadd.f32 %v893_v19, %v892_v17  ;;  %v647_v4 = vadd.f32 %v931_v54, %v582_v53 }
 0x10e   :  { %v895_v21 = vpop.f32.mrf.mxu0  ;;  %v934_v5 = vadd.f32 %v933_v20, %v932_v18 }
 0x10f   :  { %v935_v22 = vpop.f32.mrf.mxu1  ;;  %v585_v60 = vadd.f32 %v894_v48, %v1160_v39 }
 0x110   :  { %v896_v23 = vpop.f32.mrf.mxu0 }
 0x111   :  { %v936_v24 = vpop.f32.mrf.mxu1  ;;  %v897_v6 = vadd.f32 %v896_v23, %v895_v21  ;;  %v650_v10 = vadd.f32 %v934_v5, %v585_v60 }
 0x112   :  { %v898_v25 = vpop.f32.mrf.mxu0  ;;  %v937_v16 = vadd.f32 %v936_v24, %v935_v22 }
 0x113   :  { %v1153_v26 = vpop.f32.mrf.mxu1  ;;  %v590_v20 = vadd.f32 %v897_v6, %v1160_v39 }
 0x114   :  { %v899_v27 = vpop.f32.mrf.mxu0 }
 0x115   :  { %v1155_v28 = vpop.f32.mrf.mxu1  ;;  %v900_v21 = vadd.f32 %v899_v27, %v898_v25 }
 0x116   :  { %v901_v29 = vpop.f32.mrf.mxu0  ;;  %v940_v46 = vadd.f32 %v1155_v28, %v1153_v26 }
 0x117   :  { %v941_v30 = vpop.f32.mrf.mxu1 }
 0x118   :  { %v902_v31 = vpop.f32.mrf.mxu0 }
 0x119   :  { %v942_v32 = vpop.f32.mrf.mxu1  ;;  %v903_v50 = vadd.f32 %v902_v31, %v901_v29 }
 0x11a   :  { %v904_v33 = vpop.f32.mrf.mxu0  ;;  %v943_v61 = vadd.f32 %v942_v32, %v941_v30 }
 0x11b   :  { %v944_v34 = vpop.f32.mrf.mxu1  ;;  %v598_v63 = vadd.f32 %v903_v50, %v1160_v39 }
 0x11c   :  { %v905_v35 = vpop.f32.mrf.mxu0 }
 0x11d   :  { %v945_v36 = vpop.f32.mrf.mxu1  ;;  %v906_v0 = vadd.f32 %v905_v35, %v904_v33  ;;  %v663_v17 = vadd.f32 %v943_v61, %v598_v63 }
 0x11e   :  { %v963_v38 = vpop.f32.mrf.mxu0  ;;  %v946_v32 = vadd.f32 %v945_v36, %v944_v34  ;;  %v593_v34 = vadd.f32 %v900_v21, %v1160_v39 }
 0x11f   :  { %v981_v40 = vpop.f32.mrf.mxu1  ;;  %v601_v19 = vadd.f32 %v906_v0, %v1160_v39 }
 0x120   :  { %v964_v41 = vpop.f32.mrf.mxu0  ;;  %v658_v50 = vadd.f32 %v940_v46, %v593_v34 }
 0x121   :  { %v982_v43 = vpop.f32.mrf.mxu1  ;;  %v965_v51 = vadd.f32 %v964_v41, %v963_v38  ;;  %v655_v41 = vadd.f32 %v937_v16, %v590_v20 }
 0x122   :  { %v966_v47 = vpop.f32.mrf.mxu0  ;;  %v983_v11 = vadd.f32 %v982_v43, %v981_v40  ;;  %v666_v40 = vadd.f32 %v946_v32, %v601_v19 }
 0x123   :  { %v984_v49 = vpop.f32.mrf.mxu1  ;;  %v704_v3 = vadd.f32 %v965_v51, %v639_v56 }
 0x124   :  { %v967_v52 = vpop.f32.mrf.mxu0  ;;  %v728_v22 = vadd.f32 %v983_v11, %v663_v17 }
 0x125   :  { %v985_v55 = vpop.f32.mrf.mxu1  ;;  %v968_v1 = vadd.f32 %v967_v52, %v966_v47 }
 0x126   :  { %v969_v58 = vpop.f32.mrf.mxu0  ;;  %v986_v33 = vadd.f32 %v985_v55, %v984_v49 }
 0x127   :  { %v996_v62 = vpop.f32.mrf.mxu1  ;;  %v707_v18 = vadd.f32 %v968_v1, %v642_v9 }
 0x128   :  { %v970_v2 = vpop.f32.mrf.mxu0  ;;  %v731_v45 = vadd.f32 %v986_v33, %v666_v40 }
 0x129   :  { %v971_v7 = vadd.f32 %v970_v2, %v969_v58  ;;  %v768_v8 = vpop.f32.mrf.mxu1 }
 0x12a   :  { %v769_v13 = vadd.f32 %v768_v8, %v704_v3  ;;  %v972_v14 = vpop.f32.mrf.mxu0 }
 0x12b   :  { %v712_v12 = vadd.f32 %v971_v7, %v647_v4  ;;  %v997_v15 = vpop.f32.mrf.mxu1 }
 0x12c   :  { %799 = vst [vmem:[%s1199_s3] sm:$0xff] %v769_v13  ;;  %v973_v29 = vpop.f32.mrf.mxu0 }
 0x12d   :  { %v777_v23 = vadd.f32 %v996_v62, %v712_v12  ;;  %v974_v30 = vadd.f32 %v973_v29, %v972_v14  ;;  %v771_v31 = vpop.f32.mrf.mxu1 }
 0x12e   :  { %v772_v35 = vadd.f32 %v771_v31, %v707_v18  ;;  %v975_v37 = vpop.f32.mrf.mxu0 }
 0x12f   :  { %801 = vst [vmem:[%s1199_s3 + $0x10] sm:$0xff] %v777_v23  ;;  %v715_v24 = vadd.f32 %v974_v30, %v650_v10  ;;  %v1000_v38 = vpop.f32.mrf.mxu1 }
 0x130   :  { %800 = vst [vmem:[%s1199_s3 + $0x8] sm:$0xff] %v772_v35  ;;  %v793_v25 = vadd.f32 %v1000_v38, %v728_v22  ;;  %v976_v27 = vpop.f32.mrf.mxu0 }
 0x131   :  { %v780_v36 = vadd.f32 %v997_v15, %v715_v24  ;;  %v977_v42 = vadd.f32 %v976_v27, %v975_v37  ;;  %v784_v43 = vpop.f32.mrf.mxu1 }
 0x132   :  { %805 = vst [vmem:[%s1199_s3 + $0x30] sm:$0xff] %v793_v25  ;;  %v978_v44 = vpop.f32.mrf.mxu0 }
 0x133   :  { %802 = vst [vmem:[%s1199_s3 + $0x18] sm:$0xff] %v780_v36  ;;  %v720_v47 = vadd.f32 %v977_v42, %v655_v41  ;;  %v1001_v48 = vpop.f32.mrf.mxu1 }
 0x134   :  { %v796_v49 = vadd.f32 %v1001_v48, %v731_v45  ;;  %v979_v39 = vpop.f32.mrf.mxu0 }
 0x135   :  { %v785_v51 = vadd.f32 %v784_v43, %v720_v47  ;;  %v980_v52 = vadd.f32 %v979_v39, %v978_v44  ;;  %v787_v28 = vpop.f32.mrf.mxu1 }
 0x136   :  { %806 = vst [vmem:[%s1199_s3 + $0x38] sm:$0xff] %v796_v49 }
 0x137   :  { %803 = vst [vmem:[%s1199_s3 + $0x20] sm:$0xff] %v785_v51  ;;  %v723_v26 = vadd.f32 %v980_v52, %v658_v50 }
 0x139   :  { %v788_v53 = vadd.f32 %v787_v28, %v723_v26 }
 0x13b   :  { %804 = vst [vmem:[%s1199_s3 + $0x28] sm:$0xff] %v788_v53 }
 0x13c   :  { %811 = vsyncpa [#allocation3], 1 }
 0x13d   :  { %812 = vsyncpa [#allocation5], 1 }

</bundles_post_ra>
